<compile_context>
chip_gen: v5e
topology: v5e:2x2
jax: 0.10.0
libtpu: 0.0.40
codegen_flags: <defaults>
</compile_context>

<pallas_src>
import functools

import jax
import jax.numpy as jnp
from jax.experimental import pallas as pl
from jax.experimental.pallas import tpu as pltpu


def _round_up(x, m):
    return (x + m - 1) // m * m


# ---------------------------------------------------------------------------
# Fused kernel: whole MLP per batch tile; activations never leave VMEM.
# ---------------------------------------------------------------------------
def _fused_mlp_kernel(*refs):
    # refs = (x_ref, w0, b0, w1, b1, ..., w_final, b_final, o_ref)
    x_ref, o_ref = refs[0], refs[-1]
    wb = refs[1:-1]
    n_layers = len(wb) // 2

    h = x_ref[...]                                   # (TN, P*I), compute dtype
    for l in range(n_layers):                        # unrolled at trace time
        w = wb[2 * l][...]                           # (P*I_l, P*O_l) block-diag
        b = wb[2 * l + 1][...]                       # (1, P*O_l) float32
        z = jnp.dot(h, w, preferred_element_type=jnp.float32) + b
        if l < n_layers - 1:
            # Dropout(eval) == identity; BN affine folded into the next layer.
            z = jnp.maximum(z, 0.0)                  # ReLU
            h = z.astype(w.dtype)                    # back to MXU compute dtype
        else:
            h = z
    o_ref[...] = h.astype(o_ref.dtype)               # width % 128 == 0 -> dense vst


# ---------------------------------------------------------------------------
# Host-side parameter preparation: BN fold + block-diagonal packing + padding.
# ---------------------------------------------------------------------------
def _block_diag(w):
    """(P, I, O) per-parallel weights -> (P*I, P*O) block-diagonal matrix."""
    P, I, O = w.shape
    eye = jnp.eye(P, dtype=w.dtype)
    return (w[:, :, None, :] * eye[:, None, :, None]).reshape(P * I, P * O)


def prepare_fused_params(params, compute_dtype=jnp.float32, lane_multiple=128):
    """Fold eval-mode BN into the following linear (f32), pack per-parallel
    weights block-diagonally, pad the final layer to a multiple of 128 output
    lanes, and cast MXU operands to `compute_dtype` (biases stay f32)."""
    hidden = params["hidden"]
    wf, bf = params["final"]
    ws = [layer["w"] for layer in hidden] + [wf]         # (P, I, O) each
    bs = [layer["b"] for layer in hidden] + [bf]         # (P, O) each

    # BN after hidden layer l:  y = relu(x W_l + b_l) * s_l + t_l  (per-P)
    # Fold into layer l+1:      W'_{l+1} = s_l * W_{l+1}
    #                           b'_{l+1} = b_{l+1} + t_l * sum_i W_{l+1}[:, i, :]
    for l, layer in enumerate(hidden):
        s, t = layer["scale"], layer["shift"]
        w_next, b_next = ws[l + 1], bs[l + 1]
        bs[l + 1] = b_next + t[:, None] * w_next.sum(axis=1)
        ws[l + 1] = s[:, None, None] * w_next

    P = ws[0].shape[0]
    widths = [P * ws[0].shape[1]] + [P * w.shape[2] for w in ws]
    if max(widths) > 512:
        # TODO(synk): switch to a P grid axis with per-parallel (I, O) weights
        # once P*width grows; block-diag packing inflates bytes/FLOPs by P.
        raise NotImplementedError("block-diagonal packing only used at small P*width")

    flat = []
    last = len(ws) - 1
    for l, (w, b) in enumerate(zip(ws, bs)):
        wd = _block_diag(w.astype(jnp.float32))          # fold done in f32
        bd = b.reshape(1, -1).astype(jnp.float32)
        if l == last:                                    # lane-dense final store
            po = wd.shape[1]
            po_pad = _round_up(po, lane_multiple)
            if po_pad != po:
                wd = jnp.pad(wd, ((0, 0), (0, po_pad - po)))
                bd = jnp.pad(bd, ((0, 0), (0, po_pad - po)))
        flat.append(wd.astype(compute_dtype))            # MXU operand dtype
        flat.append(bd)                                  # bias stays f32
    return flat


# ---------------------------------------------------------------------------
# Public forward: one pallas_call, batch grid, weights resident in VMEM.
# ---------------------------------------------------------------------------
@functools.partial(jax.jit, static_argnames=("n_out", "batch_tile"))
def parallel_net_forward(x_npf, fused_params, *, n_out, batch_tile=None):
    """x_npf: (batch, n_parallel, n_in) -> (batch, n_parallel, n_out)."""
    N, P, I = x_npf.shape
    PI = P * I
    PO_pad = fused_params[-1].shape[-1]                  # padded final width (%128==0)
    compute_dtype = fused_params[0].dtype
    out_dtype = x_npf.dtype

    sublane = 8 * (4 // jnp.dtype(compute_dtype).itemsize)   # 8 (f32) / 16 (bf16)
    if batch_tile is None:
        batch_tile = min(_round_up(N, sublane), 256)     # >=128-256 rows fills MXU M
    TN = _round_up(batch_tile, sublane)
    N_pad = _round_up(N, TN)

    x2d = x_npf.reshape(N, PI).astype(compute_dtype)     # free reshape + cheap cast
    if N_pad != N:
        x2d = jnp.pad(x2d, ((0, N_pad - N), (0, 0)))

    grid = (pl.cdiv(N_pad, TN),)

    in_specs = [pl.BlockSpec((TN, PI), lambda i: (i, 0))]
    for p in fused_params:
        # Full-extent block + constant index_map: parameters stay resident in
        # VMEM across all batch tiles (no re-DMA on revisit).
        in_specs.append(pl.BlockSpec(p.shape, lambda i: (0, 0)))
    out_specs = pl.BlockSpec((TN, PO_pad), lambda i: (i, 0))

    # VMEM budget: resident params + double-buffered activation/output tiles.
    param_bytes = sum(int(p.size) * p.dtype.itemsize for p in fused_params)
    tile_bytes = (TN * PI * jnp.dtype(compute_dtype).itemsize
                  + TN * PO_pad * jnp.dtype(out_dtype).itemsize)
    needed = param_bytes + 2 * tile_bytes
    vmem_limit = int(min(max(2 * needed, 32 << 20), 64 << 20))

    flops = 2 * N_pad * sum(int(w.shape[0]) * int(w.shape[1])
                            for w in fused_params[0::2])
    bytes_accessed = (int(x2d.size) * x2d.dtype.itemsize + param_bytes
                      + N_pad * PO_pad * jnp.dtype(out_dtype).itemsize)

    out2d = pl.pallas_call(
        _fused_mlp_kernel,
        out_shape=jax.ShapeDtypeStruct((N_pad, PO_pad), out_dtype),
        grid=grid,
        in_specs=in_specs,
        out_specs=out_specs,
        compiler_params=pltpu.CompilerParams(
            dimension_semantics=("parallel",),           # v7x: 2 TCs share batch tiles
            vmem_limit_bytes=vmem_limit,
        ),
        cost_estimate=pl.CostEstimate(
            flops=flops, transcendentals=0, bytes_accessed=bytes_accessed),
    )(x2d, *fused_params)

    return out2d[:N, : P * n_out].reshape(N, P, n_out)


# ---------------------------------------------------------------------------
# Deterministic parameter init (matches LinearParallel.reset_parameters bounds
# and BatchNorm1d eval-mode defaults).
# ---------------------------------------------------------------------------
def init_parallel_net(key, n_parallel, n_in, n_out, hidden_width, n_layers, eps=1e-5):
    def linear_params(key, i, o):
        kw, kb = jax.random.split(key)
        bound = 1.0 / (i ** 0.5)
        w = jax.random.uniform(kw, (n_parallel, i, o), jnp.float32, -bound, bound)
        b = jax.random.uniform(kb, (n_parallel, o), jnp.float32, -bound, bound)
        return w, b

    hidden = []
    dims = [(n_in, hidden_width)] + [(hidden_width, hidden_width)] * (n_layers - 2)
    for (i, o) in dims:
        key, sub = jax.random.split(key)
        w, b = linear_params(sub, i, o)
        # BatchNorm1d(n_parallel) eval-mode running stats / affine defaults.
        gamma = jnp.ones((n_parallel,), jnp.float32)
        beta = jnp.zeros((n_parallel,), jnp.float32)
        rmean = jnp.zeros((n_parallel,), jnp.float32)
        rvar = jnp.ones((n_parallel,), jnp.float32)
        inv = gamma / jnp.sqrt(rvar + eps)
        hidden.append(dict(w=w, b=b, scale=inv, shift=beta - rmean * inv))

    key, sub = jax.random.split(key)
    wf, bf = linear_params(sub, hidden_width, n_out)
    return dict(hidden=hidden, final=(wf, bf))


# ---------------------------------------------------------------------------
# Pure-JAX reference on the ORIGINAL (unfused, per-parallel) parameters.
# ---------------------------------------------------------------------------
def parallel_net_reference(x_npf, params):
    x = x_npf
    for layer in params["hidden"]:
        z = jnp.einsum("npi,pio->npo", x, layer["w"]) + layer["b"][None]
        z = jnp.maximum(z, 0.0)
        z = z * layer["scale"][None, :, None] + layer["shift"][None, :, None]
        x = z
    wf, bf = params["final"]
    return jnp.einsum("npi,pio->npo", x, wf) + bf[None]


# ---------------------------------------------------------------------------
if __name__ == "__main__":
    # Small shapes consistent with the module.
    batch, n_parallel, n_in, n_out = 64, 4, 16, 8
    hidden_width, n_layers = 32, 3

    key = jax.random.PRNGKey(0)
    key, kx, kp = jax.random.split(key, 3)

    x = jax.random.normal(kx, (batch, n_parallel, n_in), jnp.float32)
    params = init_parallel_net(kp, n_parallel, n_in, n_out, hidden_width, n_layers)
    ref = parallel_net_reference(x, params)

    # f32 path with batch_tile=16 -> grid of 4 steps: exercises the pipelined
    # batch grid + resident-weight revisit; tight tolerance vs the reference.
    fused_f32 = prepare_fused_params(params, compute_dtype=jnp.float32)
    out_f32 = jax.block_until_ready(
        parallel_net_forward(x, fused_f32, n_out=n_out, batch_tile=16))
    assert out_f32.shape == (batch, n_parallel, n_out)
    assert jnp.allclose(out_f32, ref, rtol=1e-5, atol=1e-5), "f32 mismatch vs reference"

    # bf16 MXU path (f32 accumulation, f32 biases), default single batch tile.
    fused_bf16 = prepare_fused_params(params, compute_dtype=jnp.bfloat16)
    out_bf16 = jax.block_until_ready(
        parallel_net_forward(x, fused_bf16, n_out=n_out))
    assert out_bf16.shape == (batch, n_parallel, n_out)
    assert jnp.allclose(out_bf16, ref, rtol=5e-2, atol=5e-2), "bf16 mismatch vs reference"

    print("KERNEL_OK")
</pallas_src>

<mosaic_0001>
module attributes {stable_mosaic.version = 11 : i64} {
  func.func @_fused_mlp_kernel(%arg0: i32, %arg1: memref<16x64xf32, #tpu.memory_space<vmem>>, %arg2: memref<64x128xf32, #tpu.memory_space<vmem>>, %arg3: memref<1x128xf32, #tpu.memory_space<vmem>>, %arg4: memref<128x128xf32, #tpu.memory_space<vmem>>, %arg5: memref<1x128xf32, #tpu.memory_space<vmem>>, %arg6: memref<128x128xf32, #tpu.memory_space<vmem>>, %arg7: memref<1x128xf32, #tpu.memory_space<vmem>>, %arg8: memref<16x128xf32, #tpu.memory_space<vmem>>) attributes {dimension_semantics = [#tpu.dimension_semantics<parallel>], iteration_bounds = array<i64: 4>, scalar_prefetch = 0 : i64, scratch_operands = 0 : i64, tpu.core_type = #tpu.core_type<tc>, window_params = [{transform_indices = @transform_0, window_bounds = array<i64: 16, 64>}, {pipeline_mode = #tpu.pipeline_mode<synchronous>, transform_indices = @transform_1, window_bounds = array<i64: 64, 128>}, {pipeline_mode = #tpu.pipeline_mode<synchronous>, transform_indices = @transform_2, window_bounds = array<i64: 1, 128>}, {pipeline_mode = #tpu.pipeline_mode<synchronous>, transform_indices = @transform_3, window_bounds = array<i64: 128, 128>}, {pipeline_mode = #tpu.pipeline_mode<synchronous>, transform_indices = @transform_4, window_bounds = array<i64: 1, 128>}, {pipeline_mode = #tpu.pipeline_mode<synchronous>, transform_indices = @transform_5, window_bounds = array<i64: 128, 128>}, {pipeline_mode = #tpu.pipeline_mode<synchronous>, transform_indices = @transform_6, window_bounds = array<i64: 1, 128>}, {transform_indices = @transform_7, window_bounds = array<i64: 16, 128>}]} {
    %c0 = arith.constant 0 : index
    %c0_0 = arith.constant 0 : index
    %0 = vector.load %arg1[%c0, %c0_0] : memref<16x64xf32, #tpu.memory_space<vmem>>, vector<16x64xf32>
    %c0_1 = arith.constant 0 : index
    %c0_2 = arith.constant 0 : index
    %1 = vector.load %arg2[%c0_1, %c0_2] : memref<64x128xf32, #tpu.memory_space<vmem>>, vector<64x128xf32>
    %c0_3 = arith.constant 0 : index
    %c0_4 = arith.constant 0 : index
    %2 = vector.load %arg3[%c0_3, %c0_4] : memref<1x128xf32, #tpu.memory_space<vmem>>, vector<1x128xf32>
    %cst = arith.constant dense<0.000000e+00> : vector<16x128xf32>
    %3 = tpu.matmul %0, %1, %cst {dimension_numbers = #tpu.dot_dimension_numbers<[1], [0], [0], [1], [0, 0, 1, 1], [], []>} : vector<16x64xf32>, vector<64x128xf32>, vector<16x128xf32> -> vector<16x128xf32>
    %4 = vector.broadcast %2 : vector<1x128xf32> to vector<16x128xf32>
    %5 = arith.addf %3, %4 : vector<16x128xf32>
    %cst_5 = arith.constant 0.000000e+00 : f32
    %6 = vector.broadcast %cst_5 : f32 to vector<16x128xf32>
    %7 = arith.maximumf %5, %6 : vector<16x128xf32>
    %c0_6 = arith.constant 0 : index
    %c0_7 = arith.constant 0 : index
    %8 = vector.load %arg4[%c0_6, %c0_7] : memref<128x128xf32, #tpu.memory_space<vmem>>, vector<128x128xf32>
    %c0_8 = arith.constant 0 : index
    %c0_9 = arith.constant 0 : index
    %9 = vector.load %arg5[%c0_8, %c0_9] : memref<1x128xf32, #tpu.memory_space<vmem>>, vector<1x128xf32>
    %cst_10 = arith.constant dense<0.000000e+00> : vector<16x128xf32>
    %10 = tpu.matmul %7, %8, %cst_10 {dimension_numbers = #tpu.dot_dimension_numbers<[1], [0], [0], [1], [0, 0, 1, 1], [], []>} : vector<16x128xf32>, vector<128x128xf32>, vector<16x128xf32> -> vector<16x128xf32>
    %11 = vector.broadcast %9 : vector<1x128xf32> to vector<16x128xf32>
    %12 = arith.addf %10, %11 : vector<16x128xf32>
    %cst_11 = arith.constant 0.000000e+00 : f32
    %13 = vector.broadcast %cst_11 : f32 to vector<16x128xf32>
    %14 = arith.maximumf %12, %13 : vector<16x128xf32>
    %c0_12 = arith.constant 0 : index
    %c0_13 = arith.constant 0 : index
    %15 = vector.load %arg6[%c0_12, %c0_13] : memref<128x128xf32, #tpu.memory_space<vmem>>, vector<128x128xf32>
    %c0_14 = arith.constant 0 : index
    %c0_15 = arith.constant 0 : index
    %16 = vector.load %arg7[%c0_14, %c0_15] : memref<1x128xf32, #tpu.memory_space<vmem>>, vector<1x128xf32>
    %cst_16 = arith.constant dense<0.000000e+00> : vector<16x128xf32>
    %17 = tpu.matmul %14, %15, %cst_16 {dimension_numbers = #tpu.dot_dimension_numbers<[1], [0], [0], [1], [0, 0, 1, 1], [], []>} : vector<16x128xf32>, vector<128x128xf32>, vector<16x128xf32> -> vector<16x128xf32>
    %18 = vector.broadcast %16 : vector<1x128xf32> to vector<16x128xf32>
    %19 = arith.addf %17, %18 : vector<16x128xf32>
    %c0_17 = arith.constant 0 : index
    %c0_18 = arith.constant 0 : index
    %20 = vector.load %arg8[%c0_17, %c0_18] : memref<16x128xf32, #tpu.memory_space<vmem>>, vector<16x128xf32>
    tpu.vector_store %arg8[%c0_17, %c0_18], %19 {strides = array<i32>} : memref<16x128xf32, #tpu.memory_space<vmem>>, vector<16x128xf32>,
    return
  }
  func.func @transform_0(%arg0: i32) -> (i32, i32) {
    %c0_i32 = arith.constant 0 : i32
    %c0_i32_0 = arith.constant 0 : i32
    return %arg0, %c0_i32 : i32, i32
  }
  func.func @transform_1(%arg0: i32) -> (i32, i32) {
    %c0_i32 = arith.constant 0 : i32
    %c0_i32_0 = arith.constant 0 : i32
    %c0_i32_1 = arith.constant 0 : i32
    return %c0_i32, %c0_i32_0 : i32, i32
  }
  func.func @transform_2(%arg0: i32) -> (i32, i32) {
    %c0_i32 = arith.constant 0 : i32
    %c0_i32_0 = arith.constant 0 : i32
    %c0_i32_1 = arith.constant 0 : i32
    return %c0_i32, %c0_i32_0 : i32, i32
  }
  func.func @transform_3(%arg0: i32) -> (i32, i32) {
    %c0_i32 = arith.constant 0 : i32
    %c0_i32_0 = arith.constant 0 : i32
    %c0_i32_1 = arith.constant 0 : i32
    return %c0_i32, %c0_i32_0 : i32, i32
  }
  func.func @transform_4(%arg0: i32) -> (i32, i32) {
    %c0_i32 = arith.constant 0 : i32
    %c0_i32_0 = arith.constant 0 : i32
    %c0_i32_1 = arith.constant 0 : i32
    return %c0_i32, %c0_i32_0 : i32, i32
  }
  func.func @transform_5(%arg0: i32) -> (i32, i32) {
    %c0_i32 = arith.constant 0 : i32
    %c0_i32_0 = arith.constant 0 : i32
    %c0_i32_1 = arith.constant 0 : i32
    return %c0_i32, %c0_i32_0 : i32, i32
  }
  func.func @transform_6(%arg0: i32) -> (i32, i32) {
    %c0_i32 = arith.constant 0 : i32
    %c0_i32_0 = arith.constant 0 : i32
    %c0_i32_1 = arith.constant 0 : i32
    return %c0_i32, %c0_i32_0 : i32, i32
  }
  func.func @transform_7(%arg0: i32) -> (i32, i32) {
    %c0_i32 = arith.constant 0 : i32
    %c0_i32_0 = arith.constant 0 : i32
    return %arg0, %c0_i32 : i32, i32
  }
}

</mosaic_0001>

<bundles_post_ra>
// kernel: parallel_net_forward.1
= control target key start
LH: loop header
LB: loop body
LE: loop exit
PB: predicated region body
PF: predicated region fallthrough
CT: control target
= control target key end

     0   :  { %12 = vsyncpa [#allocation3], 0  ;;  %s828_s0 = inlined_call_operand.vmem [shape: f32[64,64], index: 0, kind: input, shape index: {}]   ;;  %s829_s1 = inlined_call_operand.hbm [shape: f32[64,128], index: 1, kind: input, shape index: {}]   ;;  %s830_s2 = inlined_call_operand.vmem [shape: f32[1,128], index: 2, kind: input, shape index: {}]   ;;  %s831_s3 = inlined_call_operand.vmem [shape: f32[128,128], index: 3, kind: input, shape index: {}]   ;;  %s832_s4 = inlined_call_operand.vmem [shape: f32[1,128], index: 4, kind: input, shape index: {}]   ;;  %s833_s5 = inlined_call_operand.hbm [shape: f32[128,128], index: 5, kind: input, shape index: {}]   ;;  %s834_s6 = inlined_call_operand.vmem [shape: f32[1,128], index: 6, kind: input, shape index: {}]   ;;  %s835_s7 = inlined_call_operand.vmem [shape: f32[64,128], index: 7, kind: output, shape index: {}]  }
   0x1   :  { %13 = vsyncpa [#allocation5], 0  ;;  %s717_s24 = smov 0  }
   0x2 LB: > { %s213_s27 = sshll.u32 %s829_s1, 4  ;;  %s530_s28 = sadd.s32 4294967295, %s671_s24   ;;  %s671_s24 = sphi %s717_s24, %s19_s24   ;;  %s214_s27 = int_to_ptr.hbm [resolvable:$true] %s213_s27 }
   0x3   : > { %p532_p0 = scmp.ge.s32.totalorder %s671_s24, 1  ;;  %p202_p1 = scmp.lt.s32.totalorder %s671_s24, 5 }
   0x4   : > { %p728_p2 = scmp.eq.s32.totalorder %s530_s28, 0  ;;  %s673_s8 = smov [#allocation2]  }
   0x5   : > { %p732_p3 = pnand %p532_p0, %p202_p1  ;;  %s215_s9 = sshll.u32 %s673_s8, 4  ;;  %s216_s9 = int_to_ptr.vmem [resolvable:$true] %s215_s9 }
   0x6   : > { %s236_s12 = sshll.u32 %s833_s5, 4  ;;  %s674_s13 = smov [#allocation4]   ;;  %s237_s12 = int_to_ptr.hbm [resolvable:$true] %s236_s12 }
   0x7   : > { %p571_p4 = pneg %p732_p3  ;;  %s238_s14 = sshll.u32 %s674_s13, 4  ;;  %s239_s14 = int_to_ptr.vmem [resolvable:$true] %s238_s14 }
   0x8   : > { %s675_s15 = smov 128   ;;  %s676_s16 = smov 8  }
   0x9   : > { %p572_p5 = pnand %p728_p2, %p571_p4  ;;  %266 = sbr.rel (%p732_p3) target bundleno = 442 (0x1ba), region = 48 }
   0xb   : > { %574 = dma.hbm_to_vmem [thread:$0]  (!%p572_p5), %s214_s27, 1024, %s216_s9, [#allocation3], %s675_s15, %s675_s15, %s676_s16  }
   0xc   : > { %577 = dma.hbm_to_vmem [thread:$0]  (!%p572_p5), %s237_s12, 2048, %s239_s14, [#allocation5], %s675_s15, %s675_s15, %s676_s16  }
   0xe   : > { %662 = dma.done.wait (%p728_p2), [#allocation3], 1024  }
   0xf   : > { %664 = vsyncadd (%p728_p2), [#allocation3], 4294966272 }
  0x10   : > { %666 = dma.done.wait (%p728_p2), [#allocation5], 2048  }
  0x11   : > { %668 = vsyncadd (%p728_p2), [#allocation5], 4294965248  ;;  %s539_s17 = sshll.u32 %s530_s28, 1  ;;  %v325_v0 = vld [vmem:[#allocation2 + $0x38] sm:$0xff]  ;;  %v324_v1 = vld [vmem:[#allocation2 + $0x30] sm:$0xff]  ;;  %vm330_vm0 = vcmask 523264  }
  0x12   : > { %p305_p6 = scmp.lt.s32.totalorder %s539_s17, 7  ;;  %345 = vmatpush.msra.mxu0 %v325_v0  ;;  %v323_v2 = vld [vmem:[#allocation2 + $0x28] sm:$0xff]  ;;  %v377_v3 = vld [vmem:[%s831_s3 + $0x78] sm:$0xff]  ;;  %v376_v4 = vld [vmem:[%s831_s3 + $0x70] sm:$0xff] }
  0x13   : > { %v322_v5 = vld [vmem:[#allocation2 + $0x20] sm:$0xff]  ;;  %382 = vmatpush.msra.mxu1 %v377_v3  ;;  %547 = vmatpush.msra.mxu3 %v377_v3  ;;  %v375_v6 = vld [vmem:[%s831_s3 + $0x68] sm:$0xff]  ;;  %v321_v7 = vld [vmem:[#allocation2 + $0x18] sm:$0xff] }
  0x14   : > { %346 = vmatpush.msra.mxu0 %v324_v1  ;;  %s839_s17 = smov (!%p305_p6, %s539_s17), 7  ;;  %v374_v8 = vld [vmem:[%s831_s3 + $0x60] sm:$0xff]  ;;  %v320_v9 = vld [vmem:[#allocation2 + $0x10] sm:$0xff]  ;;  %v373_v10 = vld [vmem:[%s831_s3 + $0x58] sm:$0xff] }
  0x15   : > { %383 = vmatpush.msra.mxu1 %v376_v4  ;;  %548 = vmatpush.msra.mxu3 %v376_v4  ;;  %s540_s25 = sshll.u32 %s839_s17, 3  ;;  %v319_v11 = vld [vmem:[#allocation2 + $0x8] sm:$0xff]  ;;  %v372_v12 = vld [vmem:[%s831_s3 + $0x50] sm:$0xff]  ;;  %v318_v13 = vld [vmem:[#allocation2] sm:$0xff] }
  0x16   : > { %347 = vmatpush.msra.mxu0 %v323_v2  ;;  %s308_s9 = scalar_lea.vmem %s828_s0, %s540_s25  ;;  %v371_v15 = vld [vmem:[%s831_s3 + $0x48] sm:$0xff]  ;;  %v370_v16 = vld [vmem:[%s831_s3 + $0x40] sm:$0xff]  ;;  %v369_v17 = vld [vmem:[%s831_s3 + $0x38] sm:$0xff]  ;;  %s314_s21 = scalar_lea.vmem %s835_s7, %s540_s25 }
  0x17   : > { %384 = vmatpush.msra.mxu1 %v375_v6  ;;  %549 = vmatpush.msra.mxu3 %v375_v6  ;;  %v316_v14 = vld [vmem:[%s308_s9] sm:$0xff]  ;;  %v368_v18 = vld [vmem:[%s831_s3 + $0x30] sm:$0xff]  ;;  %v317_v19 = vld [vmem:[%s308_s9 + $0x8] sm:$0xff] }
  0x18   : > { %348 = vmatpush.msra.mxu0 %v322_v5  ;;  %v367_v20 = vld [vmem:[%s831_s3 + $0x28] sm:$0xff]  ;;  %v366_v21 = vld [vmem:[%s831_s3 + $0x20] sm:$0xff]  ;;  %v365_v22 = vld [vmem:[%s831_s3 + $0x18] sm:$0xff] }
  0x19   : > { %385 = vmatpush.msra.mxu1 %v374_v8  ;;  %550 = vmatpush.msra.mxu3 %v374_v8  ;;  %v364_v23 = vld [vmem:[%s831_s3 + $0x10] sm:$0xff]  ;;  %v363_v24 = vld [vmem:[%s831_s3 + $0x8] sm:$0xff]  ;;  %v362_v25 = vld [vmem:[%s831_s3] sm:$0xff] }
  0x1a   : > { %349 = vmatpush.msra.mxu0 %v321_v7  ;;  %v422_v26 = vld [vmem:[#allocation4 + $0x78] sm:$0xff]  ;;  %v421_v27 = vld [vmem:[#allocation4 + $0x70] sm:$0xff]  ;;  %v420_v28 = vld [vmem:[#allocation4 + $0x68] sm:$0xff] }
  0x1b   : > { %386 = vmatpush.msra.mxu1 %v373_v10  ;;  %551 = vmatpush.msra.mxu3 %v373_v10  ;;  %v419_v29 = vld [vmem:[#allocation4 + $0x60] sm:$0xff]  ;;  %v418_v30 = vld [vmem:[#allocation4 + $0x58] sm:$0xff]  ;;  %v417_v31 = vld [vmem:[#allocation4 + $0x50] sm:$0xff] }
  0x1c   : > { %350 = vmatpush.msra.mxu0 %v320_v9  ;;  %427 = vmatpush.msra.mxu2 %v422_v26  ;;  %v416_v32 = vld [vmem:[#allocation4 + $0x48] sm:$0xff]  ;;  %v415_v33 = vld [vmem:[#allocation4 + $0x40] sm:$0xff]  ;;  %v414_v34 = vld [vmem:[#allocation4 + $0x38] sm:$0xff] }
  0x1d   : > { %387 = vmatpush.msra.mxu1 %v372_v12  ;;  %552 = vmatpush.msra.mxu3 %v372_v12  ;;  %v594_v35 = vld [vmem:[%s830_s2] ss:$0 sm:$0xff]  ;;  %v413_v36 = vld [vmem:[#allocation4 + $0x30] sm:$0xff]  ;;  %v412_v37 = vld [vmem:[#allocation4 + $0x28] sm:$0xff] }
  0x1e   : > { %351 = vmatpush.msra.mxu0 %v319_v11  ;;  %428 = vmatpush.msra.mxu2 %v421_v27  ;;  %v411_v40 = vld [vmem:[#allocation4 + $0x20] sm:$0xff]  ;;  %v410_v42 = vld [vmem:[#allocation4 + $0x18] sm:$0xff]  ;;  %v409_v46 = vld [vmem:[#allocation4 + $0x10] sm:$0xff] }
  0x1f   : > { %388 = vmatpush.msra.mxu1 %v371_v15  ;;  %553 = vmatpush.msra.mxu3 %v371_v15  ;;  %v408_v47 = vld [vmem:[#allocation4 + $0x8] sm:$0xff]  ;;  %v407_v48 = vld [vmem:[#allocation4] sm:$0xff] }
  0x20   : > { %352 = vmatpush.msra.mxu0 %v318_v13  ;;  %429 = vmatpush.msra.mxu2 %v420_v28  ;;  %v595_v49 = vld [vmem:[%s832_s4] ss:$0 sm:$0xff] }
  0x21   : > { %543 = vmatmul.msk.f32.vlgmr.msra.gmra.mxu0 %vm330_vm0, %v316_v14  ;;  %389 = vmatpush.msra.mxu1 %v370_v16  ;;  %v596_v56 = vld [vmem:[%s834_s6] ss:$0 sm:$0xff] }
  0x22   : > { %554 = vmatpush.msra.mxu3 %v370_v16  ;;  %430 = vmatpush.msra.mxu2 %v419_v29 }
  0x23   : > { %390 = vmatpush.msra.mxu1 %v369_v17 }
  0x24   : > { %555 = vmatpush.msra.mxu3 %v369_v17  ;;  %431 = vmatpush.msra.mxu2 %v418_v30 }
  0x25   : > { %391 = vmatpush.msra.mxu1 %v368_v18 }
  0x26   : > { %556 = vmatpush.msra.mxu3 %v368_v18  ;;  %432 = vmatpush.msra.mxu2 %v417_v31 }
  0x27   : > { %392 = vmatpush.msra.mxu1 %v367_v20 }
  0x28   : > { %557 = vmatpush.msra.mxu3 %v367_v20  ;;  %433 = vmatpush.msra.mxu2 %v416_v32 }
  0x29   : > { %544 = vmatmul.msk.f32.gmra.mxu0 %vm330_vm0, %v317_v19  ;;  %393 = vmatpush.msra.mxu1 %v366_v21 }
  0x2a   : > { %558 = vmatpush.msra.mxu3 %v366_v21  ;;  %434 = vmatpush.msra.mxu2 %v415_v33 }
  0x2b   : > { %394 = vmatpush.msra.mxu1 %v365_v22 }
  0x2c   : > { %559 = vmatpush.msra.mxu3 %v365_v22  ;;  %435 = vmatpush.msra.mxu2 %v414_v34 }
  0x2d   : > { %395 = vmatpush.msra.mxu1 %v364_v23 }
  0x2e   : > { %560 = vmatpush.msra.mxu3 %v364_v23  ;;  %436 = vmatpush.msra.mxu2 %v413_v36 }
  0x2f   : > { %396 = vmatpush.msra.mxu1 %v363_v24 }
  0x30   : > { %561 = vmatpush.msra.mxu3 %v363_v24  ;;  %437 = vmatpush.msra.mxu2 %v412_v37 }
  0x31   : > { %397 = vmatpush.msra.mxu1 %v362_v25 }
  0x32   : > { %562 = vmatpush.msra.mxu3 %v362_v25  ;;  %438 = vmatpush.msra.mxu2 %v411_v40 }
  0x34   : > { %439 = vmatpush.msra.mxu2 %v410_v42 }
  0x36   : > { %440 = vmatpush.msra.mxu2 %v409_v46 }
  0x38   : > { %441 = vmatpush.msra.mxu2 %v408_v47 }
  0x3a   : > { %442 = vmatpush.msra.mxu2 %v407_v48 }
  0x9e   : > { %v354_v38 = vpop.f32.mrf.mxu0 }
  0x9f   : > { %v355_v39 = vadd.f32 %v594_v35, %v354_v38 }
  0xa1   : > { %v360_v41 = vmax.f32 %v355_v39, 0.0 }
  0xa3   : > { %398 = vmatmul.f32.vlgmr.msra.gmra.mxu1 %v360_v41 }
  0xa6   : > { %v357_v43 = vpop.f32.mrf.mxu0 }
  0xa7   : > { %v358_v44 = vadd.f32 %v594_v35, %v357_v43 }
  0xa9   : > { %v361_v45 = vmax.f32 %v358_v44, 0.0 }
  0xab   : > { %401 = vmatmul.f32.vlgmr.msra.gmra.mxu3 %v361_v45 }
 0x120   : > { %v399_v50 = vpop.f32.mrf.mxu1 }
 0x121   : > { %v400_v51 = vadd.f32 %v595_v49, %v399_v50 }
 0x123   : > { %v405_v52 = vmax.f32 %v400_v51, 0.0 }
 0x125   : > { %443 = vmatmul.f32.vlgmr.msra.gmra.mxu2 %v405_v52 }
 0x12e   : > { %v402_v53 = vpop.f32.mrf.mxu3 }
 0x12f   : > { %v403_v54 = vadd.f32 %v595_v49, %v402_v53 }
 0x131   : > { %v406_v55 = vmax.f32 %v403_v54, 0.0 }
 0x133   : > { %446 = vmatmul.f32.gmra.mxu2 %v406_v55 }
 0x1a8   : > { %v444_v57 = vpop.f32.mrf.mxu2 }
 0x1a9   : > { %v445_v58 = vadd.f32 %v596_v56, %v444_v57 }
 0x1ab   : > { %450 = vst [vmem:[%s314_s21] sm:$0xff] %v445_v58 }
 0x1b6   : > { %v447_v59 = vpop.f32.mrf.mxu2 }
 0x1b7   : > { %v448_v60 = vadd.f32 %v596_v56, %v447_v59 }
 0x1b9   : > { %451 = vst [vmem:[%s314_s21 + $0x8] sm:$0xff] %v448_v60 }
 0x1ba PF: > { %s19_s24 = sadd.s32 1, %s671_s24  }
 0x1bb   : > { %p16_p7 = scmp.ge.s32.totalorder %s19_s24, 6  }
 0x1bd   :  { %18 = sbr.rel (!%p16_p7) target bundleno = 2 (0x2), region = 87 }
 0x1c2   :  { %474 = vsyncpa [#allocation3], 1 }
 0x1c3   :  { %476 = vsyncpa [#allocation3 + $0x1], 1 }
 0x1c4   :  { %477 = vsyncpa [#allocation5], 1 }

</bundles_post_ra>
